<compile_context>
chip_gen: v7x
topology: tpu7x:2x2x1
jax: 0.10.0
libtpu: 0.0.40
codegen_flags: <defaults>
</compile_context>

<pallas_src>
import jax
import jax.numpy as jnp
from jax.experimental import pallas as pl
from jax.experimental.pallas import tpu as pltpu


def _round_up(n, m):
    return ((n + m - 1) // m) * m


def mlp_kernel(xt_ref, w1_ref, w2_ref, w3_ref, o_ref):
    # xt: [4, TB] = 3 features + ones row, batch on the lane axis.
    # All matmuls go to the (otherwise idle) MXU; only ReLU/abs hit the VPU.
    h1 = jnp.maximum(
        jnp.dot(w1_ref[...], xt_ref[...], preferred_element_type=jnp.float32), 0.0)  # [33, TB]
    h2 = jnp.maximum(
        jnp.dot(w2_ref[...], h1, preferred_element_type=jnp.float32), 0.0)           # [17, TB]
    # Layer 3 as an M=1 MXU dot (review item: MXU has huge slack; saves 17 VPU muls/elem).
    y = jnp.dot(w3_ref[...], h2, preferred_element_type=jnp.float32)                 # [1, TB]
    o_ref[...] = jnp.abs(y)


def learn_data_forward(x, params, *, block_rows=32768):
    """x: [B, 3] float32. params: PyTorch-layout weights/biases (see init_params)."""
    B, F = x.shape
    assert F == 3

    block_rows = max(128, _round_up(block_rows, 128))
    # Cap the tile at ceil(B/2) rounded to a full lane so the 1-D grid has >= 2
    # steps whenever possible -> dimension_semantics=("parallel",) can shard the
    # batch axis across v7x's two TensorCores (no-op on v5e/v6e).
    half = _round_up(-(-B // 2), 128)
    TB = max(128, min(block_rows, half))
    Bp = _round_up(B, TB)

    # Batch onto lanes + ReLU-invariant ones row (bias folding). With
    # allow_input_fusion below, XLA may fuse this transpose/concat/pad into the
    # kernel's input DMA instead of writing a separate [4, Bp] copy to HBM.
    xt = jnp.concatenate([x.T, jnp.ones((1, B), x.dtype)], axis=0)        # [4, B]
    if Bp != B:
        xt = jnp.pad(xt, ((0, 0), (0, Bp - B)))

    w1, b1 = params["w1"], params["b1"]        # [32, 3], [32]
    w2, b2 = params["w2"], params["b2"]        # [16, 32], [16]
    w3, b3 = params["w3"], params["b3"]        # [1, 16],  [1]
    f32 = jnp.float32

    # Augmented weights: each bias becomes an extra column, and an extra output
    # row regenerates the ones row for the next layer (ReLU(1) == 1).
    w1a = jnp.concatenate([
        jnp.concatenate([w1, b1[:, None]], axis=1),                       # [32, 4]
        jnp.array([[0.0, 0.0, 0.0, 1.0]], f32),                           # ones-row generator
    ], axis=0)                                                            # [33, 4]
    w2a = jnp.concatenate([
        jnp.concatenate([w2, b2[:, None]], axis=1),                       # [16, 33]
        jnp.concatenate([jnp.zeros((1, 32), f32), jnp.ones((1, 1), f32)], axis=1),
    ], axis=0)                                                            # [17, 33]
    w3a = jnp.concatenate([w3, b3[:, None]], axis=1)                      # [1, 17]

    grid = (Bp // TB,)
    const = lambda i: (0, 0)   # weights/biases resident across all batch tiles

    flops_per_elem = 2 * (33 * 4 + 17 * 33 + 17) + 51                     # ~1.3K flops / elem
    cost = pl.CostEstimate(
        flops=int(flops_per_elem * Bp),
        transcendentals=0,
        bytes_accessed=int(20 * Bp + 4 * (33 * 4 + 17 * 33 + 17)),        # ~20 B / elem
    )

    out = pl.pallas_call(
        mlp_kernel,
        out_shape=jax.ShapeDtypeStruct((1, Bp), jnp.float32),
        grid=grid,
        in_specs=[
            pl.BlockSpec((4, TB), lambda i: (0, i)),    # x tiles stream over the grid
            pl.BlockSpec((33, 4), const),
            pl.BlockSpec((17, 33), const),
            pl.BlockSpec((1, 17), const),
        ],
        out_specs=pl.BlockSpec((1, TB), lambda i: (0, i)),   # lane-dense output slab
        compiler_params=pltpu.CompilerParams(
            dimension_semantics=("parallel",),
            allow_input_fusion=[True, False, False, False],
        ),
        cost_estimate=cost,
    )(xt, w1a, w2a, w3a)

    return out[0, :B].reshape(B, 1)


def init_params(key):
    """Deterministic init mimicking PyTorch's default Linear init (uniform +/- 1/sqrt(fan_in)).

    Stored in native nn.Linear layout: weights [out, in], biases [out].
    """
    ks = jax.random.split(key, 6)

    def lin(kw, kb, fan_in, fan_out):
        bound = 1.0 / jnp.sqrt(jnp.float32(fan_in))
        w = jax.random.uniform(kw, (fan_out, fan_in), jnp.float32, -bound, bound)
        b = jax.random.uniform(kb, (fan_out,), jnp.float32, -bound, bound)
        return w, b

    w1, b1 = lin(ks[0], ks[1], 3, 32)
    w2, b2 = lin(ks[2], ks[3], 32, 16)
    w3, b3 = lin(ks[4], ks[5], 16, 1)
    return {"w1": w1, "b1": b1, "w2": w2, "b2": b2, "w3": w3, "b3": b3}


def reference_forward(x, p):
    hp = jax.lax.Precision.HIGHEST
    h1 = jnp.maximum(jnp.matmul(x, p["w1"].T, precision=hp) + p["b1"], 0.0)
    h2 = jnp.maximum(jnp.matmul(h1, p["w2"].T, precision=hp) + p["b2"], 0.0)
    y = jnp.matmul(h2, p["w3"].T, precision=hp) + p["b3"]
    return jnp.abs(y)


if __name__ == "__main__":
    key = jax.random.PRNGKey(0)
    k_x, k_p = jax.random.split(key)

    B = 512
    x = jax.random.normal(k_x, (B, 3), jnp.float32)
    params = init_params(k_p)

    # With B=512 the ceil(B/2) tile cap gives TB=256 -> grid=(2,), which
    # exercises the multi-tile path (and the >=2-step requirement for v7x).
    fwd = jax.jit(learn_data_forward)
    out = jax.block_until_ready(fwd(x, params))

    ref = reference_forward(x, params)
    assert out.shape == (B, 1)
    # Tolerance accounts for default MXU f32 precision vs the HIGHEST-precision reference.
    assert jnp.allclose(out, ref, atol=2e-2, rtol=2e-2), "mismatch vs pure-JAX reference"

    print("KERNEL_OK")
</pallas_src>

<mosaic_0001>
module attributes {stable_mosaic.version = 11 : i64} {
  func.func @mlp_kernel(%arg0: i32, %arg1: memref<4x256xf32, #tpu.memory_space<vmem>>, %arg2: memref<33x4xf32, #tpu.memory_space<vmem>>, %arg3: memref<17x33xf32, #tpu.memory_space<vmem>>, %arg4: memref<1x17xf32, #tpu.memory_space<vmem>>, %arg5: memref<1x256xf32, #tpu.memory_space<vmem>>) attributes {dimension_semantics = [#tpu.dimension_semantics<parallel>], iteration_bounds = array<i64: 2>, scalar_prefetch = 0 : i64, scratch_operands = 0 : i64, tpu.core_type = #tpu.core_type<tc>, window_params = [{transform_indices = @transform_0, window_bounds = array<i64: 4, 256>}, {pipeline_mode = #tpu.pipeline_mode<synchronous>, transform_indices = @transform_1, window_bounds = array<i64: 33, 4>}, {pipeline_mode = #tpu.pipeline_mode<synchronous>, transform_indices = @transform_2, window_bounds = array<i64: 17, 33>}, {pipeline_mode = #tpu.pipeline_mode<synchronous>, transform_indices = @transform_3, window_bounds = array<i64: 1, 17>}, {transform_indices = @transform_4, window_bounds = array<i64: 1, 256>}]} {
    %c0 = arith.constant 0 : index
    %c0_0 = arith.constant 0 : index
    %0 = vector.load %arg2[%c0, %c0_0] : memref<33x4xf32, #tpu.memory_space<vmem>>, vector<33x4xf32>
    %c0_1 = arith.constant 0 : index
    %c0_2 = arith.constant 0 : index
    %1 = vector.load %arg1[%c0_1, %c0_2] : memref<4x256xf32, #tpu.memory_space<vmem>>, vector<4x256xf32>
    %cst = arith.constant dense<0.000000e+00> : vector<33x256xf32>
    %2 = tpu.matmul %0, %1, %cst {dimension_numbers = #tpu.dot_dimension_numbers<[1], [0], [0], [1], [0, 0, 1, 1], [], []>} : vector<33x4xf32>, vector<4x256xf32>, vector<33x256xf32> -> vector<33x256xf32>
    %cst_3 = arith.constant 0.000000e+00 : f32
    %3 = vector.broadcast %cst_3 : f32 to vector<33x256xf32>
    %4 = arith.maximumf %2, %3 : vector<33x256xf32>
    %c0_4 = arith.constant 0 : index
    %c0_5 = arith.constant 0 : index
    %5 = vector.load %arg3[%c0_4, %c0_5] : memref<17x33xf32, #tpu.memory_space<vmem>>, vector<17x33xf32>
    %cst_6 = arith.constant dense<0.000000e+00> : vector<17x256xf32>
    %6 = tpu.matmul %5, %4, %cst_6 {dimension_numbers = #tpu.dot_dimension_numbers<[1], [0], [0], [1], [0, 0, 1, 1], [], []>} : vector<17x33xf32>, vector<33x256xf32>, vector<17x256xf32> -> vector<17x256xf32>
    %cst_7 = arith.constant 0.000000e+00 : f32
    %7 = vector.broadcast %cst_7 : f32 to vector<17x256xf32>
    %8 = arith.maximumf %6, %7 : vector<17x256xf32>
    %c0_8 = arith.constant 0 : index
    %c0_9 = arith.constant 0 : index
    %9 = vector.load %arg4[%c0_8, %c0_9] : memref<1x17xf32, #tpu.memory_space<vmem>>, vector<1x17xf32>
    %cst_10 = arith.constant dense<0.000000e+00> : vector<1x256xf32>
    %10 = tpu.matmul %9, %8, %cst_10 {dimension_numbers = #tpu.dot_dimension_numbers<[1], [0], [0], [1], [0, 0, 1, 1], [], []>} : vector<1x17xf32>, vector<17x256xf32>, vector<1x256xf32> -> vector<1x256xf32>
    %11 = math.absf %10 : vector<1x256xf32>
    %c0_11 = arith.constant 0 : index
    %c0_12 = arith.constant 0 : index
    %12 = vector.load %arg5[%c0_11, %c0_12] : memref<1x256xf32, #tpu.memory_space<vmem>>, vector<1x256xf32>
    tpu.vector_store %arg5[%c0_11, %c0_12], %11 {strides = array<i32>} : memref<1x256xf32, #tpu.memory_space<vmem>>, vector<1x256xf32>,
    return
  }
  func.func @transform_0(%arg0: i32) -> (i32, i32) {
    %c0_i32 = arith.constant 0 : i32
    %c0_i32_0 = arith.constant 0 : i32
    return %c0_i32, %arg0 : i32, i32
  }
  func.func @transform_1(%arg0: i32) -> (i32, i32) {
    %c0_i32 = arith.constant 0 : i32
    %c0_i32_0 = arith.constant 0 : i32
    %c0_i32_1 = arith.constant 0 : i32
    return %c0_i32, %c0_i32_0 : i32, i32
  }
  func.func @transform_2(%arg0: i32) -> (i32, i32) {
    %c0_i32 = arith.constant 0 : i32
    %c0_i32_0 = arith.constant 0 : i32
    %c0_i32_1 = arith.constant 0 : i32
    return %c0_i32, %c0_i32_0 : i32, i32
  }
  func.func @transform_3(%arg0: i32) -> (i32, i32) {
    %c0_i32 = arith.constant 0 : i32
    %c0_i32_0 = arith.constant 0 : i32
    %c0_i32_1 = arith.constant 0 : i32
    return %c0_i32, %c0_i32_0 : i32, i32
  }
  func.func @transform_4(%arg0: i32) -> (i32, i32) {
    %c0_i32 = arith.constant 0 : i32
    %c0_i32_0 = arith.constant 0 : i32
    return %c0_i32, %arg0 : i32, i32
  }
}

</mosaic_0001>

<bundles_post_ra>
// kernel: learn_data_forward.2
= control target key start
LH: loop header
LB: loop body
LE: loop exit
PB: predicated region body
PF: predicated region fallthrough
CT: control target
= control target key end

     0   :  { %s979_s0 = inlined_call_operand.vmem [shape: f32[33,4], index: 0, kind: input, shape index: {}]   ;;  %s980_s1 = inlined_call_operand.vmem [shape: f32[17,33], index: 1, kind: input, shape index: {}]   ;;  %s981_s2 = inlined_call_operand.vmem [shape: f32[1,17], index: 2, kind: input, shape index: {}]   ;;  %s982_s3 = inlined_call_operand.vmem [shape: f32[3,512], index: 3, kind: input, shape index: {}]   ;;  %s983_s4 = inlined_call_operand.<no memory space> [shape: f32[], index: 4, kind: input, shape index: {}]   ;;  %s984_s5 = inlined_call_operand.hbm [shape: f32[1,512], index: 5, kind: output, shape index: {}]  }
   0x1   :  { %v10_v0 = vstv %s983_s4 }
   0x2   :  { %11 = vsyncpa [#allocation8], 0 }
   0x3   :  { %13 = vsyncpa [#allocation8 + $0x1], 0  ;;  %s826_s20 = smov 0   ;;  %s828_s21 = smov 0  }
   0x4   :  { %s830_s22 = smov 0   ;;  %s832_s23 = smov 0  }
   0x5 LB: > { %s847_s24 = sadd.s32 4294967295, %s788_s23   ;;  %s643_s25 = sadd.s32 4294967294, %s788_s23   ;;  %s788_s23 = sphi %s832_s23, %s990_s23   ;;  %s784_s22 = sphi %s830_s22, %s989_s22   ;;  %s780_s21 = sphi %s828_s21, %s988_s21   ;;  %s776_s20 = sphi %s826_s20, %s987_s20  }
   0x6   : > { %s851_s26 = sadd.s32 1, %s788_s23   ;;  %s115_s27 = sadd.s32 1, %s784_s22 }
   0x7   : > { %s112_s28 = ssub.s32 %s788_s23, %s851_s26  ;;  %p125_p0 = scmp.ne.s32.totalorder %s784_s22, %s780_s21 }
   0x8   : > { %p113_p1 = scmp.eq.s32.totalorder %s112_s28, 0  ;;  %p126_p2 = scmp.eq.s32.totalorder %s847_s24, 1 }
   0x9   : > { %p131_p3 = scmp.ne.s32.totalorder %s780_s21, %s776_s20  ;;  %p132_p4 = scmp.eq.s32.totalorder %s643_s25, 1 }
   0xa   : > { %s862_s29 = scalar_select %p113_p1, %s784_s22, %s115_s27  }
   0xb   : > { %p864_p5 = por %p126_p2, %p125_p0  ;;  %p868_p6 = por %p132_p4, %p131_p3 }
   0xc   : > { %p646_p7 = scmp.ge.s32.totalorder %s788_s23, 1  ;;  %p168_p8 = scmp.lt.s32.totalorder %s788_s23, 3 }
   0xe   : > { %p169_p9 = pnand %p646_p7, %p168_p8 }
  0x10   : > { %172 = sbr.rel (%p169_p9) target bundleno = 740 (0x2e4), region = 36 }
  0x17   : > { %s648_s7 = sshll.u32 %s847_s24, 1  ;;  %v202_v1 = vlaneseq  ;;  %v790_v2 = vmov 0.0   ;;  %vm243_vm1 = vcmask 1043456   ;;  %v219_v10 = vld [vmem:[%s979_s0] sm:$0xff]  ;;  %vm227_vm2 = vcmask 31744   ;;  %v220_v11 = vld [vmem:[%s979_s0 + $0x8] sm:$0xff] }
  0x18   : > { %p195_p10 = scmp.lt.s32.totalorder %s648_s7, 3  ;;  %312 = vmatprep.mubr.f32.mxu0 %v790_v2  ;;  %437 = vmatprep.mubr.f32.mxu1 %v790_v2  ;;  %v221_v12 = vld [vmem:[%s979_s0 + $0x10] sm:$0xff]  ;;  %v222_v13 = vld [vmem:[%s979_s0 + $0x18] sm:$0xff]  ;;  %v223_v14 = vld [vmem:[%s979_s0 + $0x20] sm:$0x1]  ;;  %vm366_vm3 = vcmask 1040384  }
  0x19   : > { %v878_v3 = vshrl.u32 %v202_v1, 7  ;;  %v353_v39 = vld [vmem:[%s980_s1] sm:$0xff]  ;;  %vm356_vm4 = vcmask 269312   ;;  %v354_v40 = vld [vmem:[%s980_s1 + $0x8] sm:$0xff]  ;;  %v355_v41 = vld [vmem:[%s980_s1 + $0x10] sm:$0x1] }
  0x1a   : > { %s992_s7 = smov (!%p195_p10, %s648_s7), 3  ;;  %v462_v56 = vld [vmem:[%s981_s2] sm:$0x1]  ;;  %vm463_vm5 = vcmask 138240   ;;  %v791_v57 = vmov 1966171168  }
  0x1b   : > { %s649_s8 = sshll.u32 %s992_s7, 2  ;;  %vm205_vm0 = vcmp.lt.s32.totalorder %v878_v3, 3  ;;  %v550_v58 = vunpack.c.l.s4 %v791_v57  ;;  %s191_s18 = sand.u32 1, %s780_s21   ;;  %vm566_vm6 = vcmp.lt.s32.totalorder %v202_v1, 256 }
  0x1c   : > { %s198_s11 = scalar_lea.vmem %s982_s3, %s649_s8  ;;  %s647_s19 = sshll.u32 %s191_s18, 1 }
  0x1d   : > { %v201_v4 = vld [vmem:[%s198_s11] sm:$0x7]  ;;  %v650_v5 = vld [vmem:[%s198_s11 + $0x4] sm:$0x7]  ;;  %v551_v59 = vunpack.c.0.s8 %v550_v58  ;;  %s671_s25 = sshll.u32 %s847_s24, 5  ;;  %s193_s27 = scalar_lea.vmem [#allocation7], %s647_s19 }
  0x1e   : > { %v206_v6 = vsel %vm205_vm0, %v201_v4, %v10_v0  ;;  %v215_v7 = vsel %vm205_vm0, %v650_v5, %v10_v0  ;;  %s584_s28 = sshll.u32 %s193_s27, 4  ;;  %s937_s9 = scalar_lea.hbm %s984_s5, %s671_s25  ;;  %s939_s28 = int_to_ptr.vmem [resolvable:$true] %s584_s28 }
  0x1f   : > { %208 = vst [vmem:[#allocation9] sm:$0xf] %v206_v6  ;;  %218 = vst [vmem:[#allocation9 + $0x4] sm:$0xf] %v215_v7  ;;  %s570_s10 = scalar_lea.sflag [#allocation8], %s191_s18  ;;  %s726_s11 = scalar_lea.vmem %s939_s28, 32 }
  0x20   : > { %p727_p11 = scmp.ne.s32.totalorder %s939_s28, %s726_s11  ;;  %s792_s24 = smov [#allocation7]  }
  0x21   : > { %s730_s12 = sshll.u32 %s792_s24, 4  ;;  %s731_s12 = int_to_ptr.vmem [resolvable:$false] %s730_s12 }
  0x22   : > { %p728_p12 = pnand %p727_p11, %p864_p5  ;;  %s732_s13 = scalar_lea.vmem %s731_s12, 64 }
  0x23   : > { %p733_p0 = scmp.lt.s32.totalorder %s939_s28, %s731_s12  ;;  %p734_p1 = scmp.lt.s32.totalorder %s732_s13, %s726_s11 }
  0x24   : > { %p729_p13 = pneg %p728_p12 }
  0x25   : > { %p735_p2 = por %p734_p1, %p733_p0 }
  0x26   : > { %v224_v8 = vld [vmem:[#allocation9] sm:$0xff] }
  0x27   : > { %v226_v9 = vcombine.high %v224_v8, %v224_v8  ;;  %p736_p3 = pnand %p735_p2, %p729_p13 }
  0x29   : > { %651 = vmatprep.subr.msk.mxu0 %vm243_vm1, %v226_v9 }
  0x2a   : > { %652 = vmatpush1.msk.msra.mxu0 %vm243_vm1, %v224_v8 }
  0x2b   : > { %653 = vmatmul.mubr.msk.f32.vlgmr.msra.gmra.mrb[0].mxu0 %vm227_vm2, %v219_v10 }
  0x2c   : > { %318 = vmatprep.mubr.f32.mxu0 %v790_v2 }
  0x2f   : > { %654 = vmatmul.mubr.msk.f32.gmra.mrb[2].mxu0 %vm227_vm2, %v220_v11 }
  0x30   : > { %324 = vmatprep.mubr.f32.mxu0 %v790_v2 }
  0x33   : > { %655 = vmatmul.mubr.msk.f32.gmra.mrb[4].mxu0 %vm227_vm2, %v221_v12 }
  0x34   : > { %330 = vmatprep.mubr.f32.mxu0 %v790_v2 }
  0x37   : > { %656 = vmatmul.mubr.msk.f32.gmra.mrb[6].mxu0 %vm227_vm2, %v222_v13 }
  0x38   : > { %336 = vmatprep.mubr.f32.mxu0 %v790_v2 }
  0x3b   : > { %657 = vmatmul.mubr.msk.f32.gmra.mrb[8].mxu0 %vm227_vm2, %v223_v14 }
  0x3c   : > { %537 = vmatprep.mubr.f32.mxu0 %v790_v2 }
  0xfe   : > { %v314_v15 = vpop.f32.mrb[0].mxu0 }
  0xff   : > { %v316_v16 = vpop.f32.mrb[1].mxu0  ;;  %v343_v18 = vmax.f32 %v314_v15, 0.0 }
 0x100   : > { %v344_v21 = vmax.f32 %v316_v16, 0.0 }
 0x102   : > { %v320_v17 = vpop.f32.mrb[2].mxu0 }
 0x103   : > { %v345_v19 = vmax.f32 %v320_v17, 0.0  ;;  %v322_v20 = vpop.f32.mrb[3].mxu0 }
 0x104   : > { %v346_v22 = vmax.f32 %v322_v20, 0.0 }
 0x105   : > { %v674_v23 = vpack.c.bf16 %v345_v19, %v343_v18 }
 0x106   : > { %v326_v24 = vpop.f32.mrb[4].mxu0  ;;  %v672_v25 = vpack.c.bf16 %v346_v22, %v344_v21 }
 0x107   : > { %v328_v26 = vpop.f32.mrb[5].mxu0  ;;  %v347_v28 = vmax.f32 %v326_v24, 0.0 }
 0x108   : > { %673 = vmatprep.subr.bf16.mxu1 %v672_v25  ;;  %v348_v31 = vmax.f32 %v328_v26, 0.0 }
 0x109   : > { %675 = vmatpush1.bf16.msra.mxu1 %v674_v23 }
 0x10a   : > { %v332_v27 = vpop.f32.mrb[6].mxu0 }
 0x10b   : > { %v349_v29 = vmax.f32 %v332_v27, 0.0  ;;  %v334_v30 = vpop.f32.mrb[7].mxu0 }
 0x10c   : > { %v350_v32 = vmax.f32 %v334_v30, 0.0 }
 0x10d   : > { %v678_v33 = vpack.c.bf16 %v349_v29, %v347_v28 }
 0x10e   : > { %v676_v34 = vpack.c.bf16 %v350_v32, %v348_v31  ;;  %v338_v35 = vpop.f32.mrb[8].mxu0 }
 0x10f   : > { %v340_v36 = vpop.f32.mrb[9].mxu0  ;;  %v351_v38 = vmax.f32 %v338_v35, 0.0 }
 0x110   : > { %v352_v37 = vmax.f32 %v340_v36, 0.0  ;;  %677 = vmatprep.subr.bf16.mxu1 %v676_v34 }
 0x111   : > { %679 = vmatpush1.bf16.msra.mxu1 %v678_v33 }
 0x112   : > { %658 = vmatprep.subr.msk.mxu1 %vm366_vm3, %v352_v37 }
 0x115   : > { %659 = vmatpush1.msk.msra.mxu1 %vm366_vm3, %v351_v38 }
 0x116   : > { %660 = vmatmul.mubr.msk.f32.vlgmr.msra.gmra.mrb[0].mxu1 %vm356_vm4, %v353_v39 }
 0x117   : > { %443 = vmatprep.mubr.f32.mxu1 %v790_v2 }
 0x11a   : > { %661 = vmatmul.mubr.msk.f32.gmra.mrb[2].mxu1 %vm356_vm4, %v354_v40 }
 0x11b   : > { %449 = vmatprep.mubr.f32.mxu1 %v790_v2  ;;  %v554_v2 = vsub.s32 %v551_v59, %v878_v3 }
 0x11e   : > { %662 = vmatmul.mubr.msk.f32.gmra.mrb[4].mxu1 %vm356_vm4, %v355_v41 }
 0x1e9   : > { %v439_v42 = vpop.f32.mrb[0].mxu1 }
 0x1ea   : > { %v441_v43 = vpop.f32.mrb[1].mxu1  ;;  %v456_v45 = vmax.f32 %v439_v42, 0.0 }
 0x1eb   : > { %v457_v48 = vmax.f32 %v441_v43, 0.0 }
 0x1ed   : > { %v445_v44 = vpop.f32.mrb[2].mxu1 }
 0x1ee   : > { %v458_v46 = vmax.f32 %v445_v44, 0.0  ;;  %v447_v47 = vpop.f32.mrb[3].mxu1 }
 0x1ef   : > { %v459_v49 = vmax.f32 %v447_v47, 0.0 }
 0x1f0   : > { %v682_v50 = vpack.c.bf16 %v458_v46, %v456_v45 }
 0x1f1   : > { %v680_v51 = vpack.c.bf16 %v459_v49, %v457_v48  ;;  %v451_v52 = vpop.f32.mrb[4].mxu1 }
 0x1f2   : > { %v453_v53 = vpop.f32.mrb[5].mxu1  ;;  %v460_v55 = vmax.f32 %v451_v52, 0.0 }
 0x1f3   : > { %681 = vmatprep.subr.bf16.mxu0 %v680_v51  ;;  %v461_v54 = vmax.f32 %v453_v53, 0.0 }
 0x1f4   : > { %683 = vmatpush1.bf16.msra.mxu0 %v682_v50 }
 0x1f5   : > { %663 = vmatprep.subr.msk.mxu0 %vm366_vm3, %v461_v54 }
 0x1f8   : > { %664 = vmatpush1.msk.msra.mxu0 %vm366_vm3, %v460_v55 }
 0x1f9   : > { %665 = vmatmul.mubr.msk.f32.vlgmr.msra.gmra.mrb[10].mxu0 %vm463_vm5, %v462_v56 }
 0x2cc   : > { %v539_v60 = vpop.f32.mrb[10].mxu0 }
 0x2cd   : > { %v544_v61 = vand.u32 2147483647, %v539_v60  ;;  %v541_v62 = vpop.f32.mrb[11].mxu0 }
 0x2ce   : > { %v545_v63 = vand.u32 2147483647, %v541_v62 }
 0x2d0   : > { %v548_v4 = vcombine.low %v544_v61, %v545_v63 }
 0x2d2   : > { %v555_v5 = vrot.slane %v548_v4, %v554_v2 }
 0x2d4   : > { %v562_v6 = vrot.slane %v555_v5, %v554_v2 }
 0x2d6   : > { %568 = vst.msk [vmem:[%s193_s27] sm:$0x3] %vm566_vm6, %v562_v6 }
 0x2d7   : > { %739 = shalt.err (!%p736_p3)
}
 0x2d8   : > { %s740_s14 = scalar_lea.hbm %s937_s9, 32  ;;  %s744_s17 = scalar_lea.hbm %s984_s5, 64 }
 0x2d9   : > { %p741_p4 = scmp.ne.s32.totalorder %s937_s9, %s740_s14  ;;  %p745_p9 = scmp.lt.u32.totalorder %s937_s9, %s984_s5 }
 0x2da   : > { %p746_p10 = scmp.lt.u32.totalorder %s744_s17, %s740_s14  ;;  %p748_p12 = scmp.lt.u32.totalorder %s740_s14, %s937_s9 }
 0x2db   : > { %p742_p7 = pnand %p741_p4, %p864_p5 }
 0x2dc   : > { %p747_p11 = por %p746_p10, %p745_p9 }
 0x2dd   : > { %p743_p8 = pneg %p742_p7 }
 0x2de   : > { %p749_p13 = por %p748_p12, %p747_p11 }
 0x2e0   : > { %p750_p0 = pnand %p749_p13, %p743_p8 }
 0x2e2   : > { %753 = shalt.err (!%p750_p0)
}
 0x2e3   : > { %684 = dma.vmem_to_hbm [thread:$0]  (%p864_p5), %s939_s28, 32, %s937_s9, %s570_s10  }
 0x2e4 PF: > { %p690_p1 = scmp.ge.s32.totalorder %s788_s23, 2  ;;  %s596_s25 = sand.u32 1, %s776_s20  }
 0x2e5   : > { %s597_s27 = scalar_lea.sflag [#allocation8], %s596_s25 }
 0x2e6   : > { %p687_p2 = pnand %p690_p1, %p868_p6 }
 0x2e8   : > { %771 = dma.done.wait (!%p687_p2), %s597_s27, 32  }
 0x2e9   : > { %773 = vsyncadd (!%p687_p2), %s597_s27, 4294967264  ;;  %p16_p3 = scmp.ge.s32.totalorder %s851_s26, 4   ;;  %s987_s20 = smov %s780_s21 }
 0x2ea   : > { %s988_s21 = smov %s784_s22  ;;  %s989_s22 = smov %s862_s29 }
 0x2eb   : > { %s990_s23 = smov %s851_s26  ;;  %18 = sbr.rel (!%p16_p3) target bundleno = 5 (0x5), region = 73 }
 0x2f2   :  { %602 = vsyncpa [#allocation8], 1 }
 0x2f3   :  { %604 = vsyncpa [#allocation8 + $0x1], 1 }

</bundles_post_ra>
